<compile_context>
chip_gen: v7x
topology: tpu7x:2x2x1
jax: 0.10.0
libtpu: 0.0.40
codegen_flags: <defaults>
</compile_context>

<pallas_src>
import numpy as np
import jax
import jax.numpy as jnp
from jax.experimental import pallas as pl
from jax.experimental.pallas import tpu as pltpu


# ----------------------------------------------------------------------------
# helpers
# ----------------------------------------------------------------------------
def _round_up(x, m):
    return ((x + m - 1) // m) * m


def _sigmoid(x):
    # exact sigmoid via tanh (dedicated EUP lowering on TPU)
    return 0.5 * (jnp.tanh(0.5 * x) + 1.0)


def _pick_tile(m, tm_large=256):
    """Small M -> one block of round_up(M, 8) rows.
    Large M -> fixed tm_large-row tiles, rows padded up to a tile multiple."""
    mp8 = _round_up(m, 8)
    if mp8 <= tm_large:
        return mp8, mp8
    return _round_up(m, tm_large), tm_large


def _pad_2d(x, rows, cols):
    r, c = x.shape
    if r == rows and c == cols:
        return x
    return jnp.pad(x, ((0, rows - r), (0, cols - c)))


def _pad_gate_cols(w_t, ngates, inner, inner_p):
    """(K, ngates*inner) -> (K, ngates*inner_p): each gate band zero-padded to a
    128-lane multiple so in-kernel gate slices are whole-vreg aligned."""
    k = w_t.shape[0]
    w = w_t.reshape(k, ngates, inner)
    w = jnp.pad(w, ((0, 0), (0, 0), (0, inner_p - inner)))
    return w.reshape(k, ngates * inner_p)


def _pad_gate_bias(b, ngates, inner, inner_p):
    b = b.reshape(ngates, inner)
    b = jnp.pad(b, ((0, 0), (0, inner_p - inner)))
    return b.reshape(1, ngates * inner_p)


def _block_diag_o(o_mat, inner, inner_p, size, size_p):
    """Block-diagonal O^T so [h | c] @ blk = [h@O^T | c@O^T] in a single MXU dot."""
    o_t = o_mat.T.astype(jnp.float32)                       # (inner, size)
    blk = jnp.zeros((2 * inner_p, 2 * size_p), jnp.float32)
    blk = blk.at[:inner, :size].set(o_t)
    blk = blk.at[inner_p:inner_p + inner, size_p:size_p + size].set(o_t)
    return blk


# ----------------------------------------------------------------------------
# Pallas kernels
# ----------------------------------------------------------------------------
def _make_leaf_kernel(inner_p, has_o):
    def kernel(x_ref, w_t_ref, b_ref, *rest):
        idx = 0
        o_blk_ref = None
        if has_o:
            o_blk_ref = rest[idx]; idx += 1
        out_ref = rest[idx]

        acts = jnp.dot(x_ref[...], w_t_ref[...],
                       preferred_element_type=jnp.float32) + b_ref[...]
        # 128-lane-aligned gate bands -> whole-vreg slices
        u = jnp.tanh(acts[:, 0 * inner_p:1 * inner_p])
        i = _sigmoid(acts[:, 1 * inner_p:2 * inner_p])
        o = _sigmoid(acts[:, 2 * inner_p:3 * inner_p])
        c = i * u                         # padded lanes: sig(0)*tanh(0) = 0
        h = o * jnp.tanh(c)
        hc = jnp.concatenate([h, c], axis=1)          # lane-dense (tm, 2*inner_p)
        if has_o:
            hc = jnp.dot(hc, o_blk_ref[...], preferred_element_type=jnp.float32)
        out_ref[...] = hc
    return kernel


def _make_fwd_kernel(inner_p, ninput, has_i, has_o):
    def kernel(*refs):
        idx = 0
        h_refs = refs[idx:idx + ninput]; idx += ninput
        c0_ref, c1_ref = refs[idx], refs[idx + 1]; idx += 2
        u_refs = refs[idx:idx + ninput]; idx += ninput
        b_ref = refs[idx]; idx += 1
        i_t_ref = None
        o_blk_ref = None
        if has_i:
            i_t_ref = refs[idx]; idx += 1
        if has_o:
            o_blk_ref = refs[idx]; idx += 1
        out_ref = refs[idx]

        # acts = sum_k h_k @ U_k^T + (B with forget-constant folded in), bands aligned
        acts = jnp.dot(h_refs[0][...], u_refs[0][...],
                       preferred_element_type=jnp.float32)
        for k in range(1, ninput):
            acts = acts + jnp.dot(h_refs[k][...], u_refs[k][...],
                                  preferred_element_type=jnp.float32)
        acts = acts + b_ref[...]

        u = jnp.tanh(acts[:, 0 * inner_p:1 * inner_p])
        i = _sigmoid(acts[:, 1 * inner_p:2 * inner_p])
        o = _sigmoid(acts[:, 2 * inner_p:3 * inner_p])
        f0 = _sigmoid(acts[:, 3 * inner_p:4 * inner_p])   # constant already in bias
        f1 = _sigmoid(acts[:, 4 * inner_p:5 * inner_p])

        c0 = c0_ref[...]
        c1 = c1_ref[...]
        if has_i:
            tm = c0.shape[0]
            c01 = jnp.concatenate([c0, c1], axis=0)       # one stacked MXU dot
            c01 = jnp.dot(c01, i_t_ref[...], preferred_element_type=jnp.float32)
            c0, c1 = c01[:tm], c01[tm:]

        c = f0 * c0 + f1 * c1 + i * u                     # padded lanes stay 0
        h = o * jnp.tanh(c)
        hc = jnp.concatenate([h, c], axis=1)              # lane-dense (tm, 2*inner_p)
        if has_o:
            hc = jnp.dot(hc, o_blk_ref[...], preferred_element_type=jnp.float32)
        out_ref[...] = hc
    return kernel


# ----------------------------------------------------------------------------
# Python wrappers (one pallas_call each; batch axis tiled & "parallel")
# ----------------------------------------------------------------------------
def tree_lstm_leaf_transform(params, x, *, tm_large=256, vmem_limit_bytes=None):
    size, inner = params['size'], params['inner']
    has_o = params['O'] is not None
    inner_p = _round_up(inner, 128)
    size_p = _round_up(size, 128)
    outw = size_p if has_o else inner_p
    out_dim = size if has_o else inner

    m = x.shape[0]
    mp, tm = _pick_tile(m, tm_large)
    nblk = mp // tm
    x_p = _pad_2d(x.astype(jnp.float32), mp, size)

    w_t = _pad_gate_cols(params['W'].T.astype(jnp.float32), 3, inner, inner_p)
    b3 = _pad_gate_bias(params['B'][:3 * inner].astype(jnp.float32), 3, inner, inner_p)

    row = lambda w: pl.BlockSpec((tm, w), lambda g: (g, 0))

    def wspec(r, w):   # constant-index weights: single-buffer when multi-step grid
        if nblk > 1:
            return pl.BlockSpec((r, w), lambda g: (0, 0), pipeline_mode=pl.Buffered(1))
        return pl.BlockSpec((r, w), lambda g: (0, 0))

    in_specs = [row(size), wspec(size, 3 * inner_p), wspec(1, 3 * inner_p)]
    args = [x_p, w_t, b3]
    if has_o:
        in_specs.append(wspec(2 * inner_p, 2 * size_p))
        args.append(_block_diag_o(params['O'], inner, inner_p, size, size_p))

    cparams = dict(dimension_semantics=("parallel",))
    if vmem_limit_bytes is not None:
        cparams['vmem_limit_bytes'] = int(vmem_limit_bytes)

    out = pl.pallas_call(
        _make_leaf_kernel(inner_p, has_o),
        grid=(nblk,),
        in_specs=in_specs,
        out_specs=row(2 * outw),
        out_shape=jax.ShapeDtypeStruct((mp, 2 * outw), jnp.float32),
        compiler_params=pltpu.CompilerParams(**cparams),
    )(*args)
    return out[:m, :out_dim], out[:m, outw:outw + out_dim]


def tree_lstm_forward(params, hs, cs, constant=1.0, *, tm_large=256,
                      vmem_limit_bytes=None):
    size, inner, ninput = params['size'], params['inner'], params['ninput']
    has_i = params['I'] is not None
    has_o = params['O'] is not None
    inner_p = _round_up(inner, 128)
    size_p = _round_up(size, 128)
    outw = size_p if has_o else inner_p
    out_dim = size if has_o else inner

    m = hs[0].shape[0]
    mp, tm = _pick_tile(m, tm_large)
    nblk = mp // tm

    hs_p = [_pad_2d(h.astype(jnp.float32), mp, size) for h in hs]
    if has_i:
        cw = cs[0].shape[1]                              # projected inside the kernel
        c0_p = _pad_2d(cs[0].astype(jnp.float32), mp, cw)
        c1_p = _pad_2d(cs[1].astype(jnp.float32), mp, cw)
    else:
        cw = inner_p                                     # pad lanes to the gate band width
        c0_p = _pad_2d(cs[0].astype(jnp.float32), mp, cw)
        c1_p = _pad_2d(cs[1].astype(jnp.float32), mp, cw)

    # per-child U_k^T with 128-aligned gate bands (no wrapper-side hcat concat)
    u = params['U'].astype(jnp.float32)                  # (5*inner, ninput*size)
    u_ts = [_pad_gate_cols(u[:, k * size:(k + 1) * size].T, 5, inner, inner_p)
            for k in range(ninput)]
    # forget-gate constant folded into the bias (padded lanes stay 0)
    b = params['B'].astype(jnp.float32).reshape(5, inner)
    b = b.at[3:5, :].add(jnp.float32(constant))
    b = _pad_gate_bias(b.reshape(-1), 5, inner, inner_p)

    row = lambda w: pl.BlockSpec((tm, w), lambda g: (g, 0))

    def wspec(r, w):
        if nblk > 1:
            return pl.BlockSpec((r, w), lambda g: (0, 0), pipeline_mode=pl.Buffered(1))
        return pl.BlockSpec((r, w), lambda g: (0, 0))

    in_specs = ([row(size)] * ninput + [row(cw), row(cw)]
                + [wspec(size, 5 * inner_p)] * ninput + [wspec(1, 5 * inner_p)])
    args = hs_p + [c0_p, c1_p] + u_ts + [b]
    if has_i:
        i_t = jnp.pad(params['I'].T.astype(jnp.float32),
                      ((0, 0), (0, inner_p - inner)))     # (size, inner_p)
        in_specs.append(wspec(i_t.shape[0], inner_p))
        args.append(i_t)
    if has_o:
        in_specs.append(wspec(2 * inner_p, 2 * size_p))
        args.append(_block_diag_o(params['O'], inner, inner_p, size, size_p))

    cparams = dict(dimension_semantics=("parallel",))
    if vmem_limit_bytes is not None:
        cparams['vmem_limit_bytes'] = int(vmem_limit_bytes)

    out = pl.pallas_call(
        _make_fwd_kernel(inner_p, ninput, has_i, has_o),
        grid=(nblk,),
        in_specs=in_specs,
        out_specs=row(2 * outw),
        out_shape=jax.ShapeDtypeStruct((mp, 2 * outw), jnp.float32),
        compiler_params=pltpu.CompilerParams(**cparams),
    )(*args)
    return out[:m, :out_dim], out[:m, outw:outw + out_dim]


# ----------------------------------------------------------------------------
# Parameter init (reset_parameters(): every parameter ~ N(0,1)) + pure-JAX refs
# ----------------------------------------------------------------------------
def init_tree_lstm(key, size, inner_size=None, ninput=2, leaf=False):
    inner = size if inner_size is None else inner_size
    ks = jax.random.split(key, 5)
    return dict(
        size=size, inner=inner, ninput=ninput,
        W=jax.random.normal(ks[0], (3 * inner, size), jnp.float32) if leaf else None,
        U=jax.random.normal(ks[1], (5 * inner, ninput * size), jnp.float32),
        B=jax.random.normal(ks[2], (5 * inner,), jnp.float32),
        O=jax.random.normal(ks[3], (size, inner), jnp.float32) if inner_size is not None else None,
        I=jax.random.normal(ks[4], (inner, size), jnp.float32) if inner_size is not None else None,
    )


def leaf_transform_ref(params, x):
    inner = params['inner']
    acts = x @ params['W'].T + params['B'][:3 * inner]
    u, i, o = jnp.split(acts, 3, axis=-1)
    u, i, o = jnp.tanh(u), jax.nn.sigmoid(i), jax.nn.sigmoid(o)
    c = i * u
    h = o * jnp.tanh(c)
    if params['O'] is not None:
        c = c @ params['O'].T
        h = h @ params['O'].T
    return h, c


def forward_ref(params, hs, cs, constant=1.0):
    acts = jnp.concatenate(hs, axis=1) @ params['U'].T + params['B']
    a = jnp.split(acts, 5, axis=1)
    u, i, o = jnp.tanh(a[0]), jax.nn.sigmoid(a[1]), jax.nn.sigmoid(a[2])
    f0 = jax.nn.sigmoid(a[3] + constant)
    f1 = jax.nn.sigmoid(a[4] + constant)
    c0, c1 = cs
    if params['I'] is not None:
        c0 = c0 @ params['I'].T
        c1 = c1 @ params['I'].T
    c = f0 * c0 + f1 * c1 + i * u
    h = o * jnp.tanh(c)
    if params['O'] is not None:
        c = c @ params['O'].T
        h = h @ params['O'].T
    return h, c


# ----------------------------------------------------------------------------
if __name__ == "__main__":
    key = jax.random.PRNGKey(0)
    k_pa, k_pb, k_x, k_h0, k_h1, k_c0, k_c1 = jax.random.split(key, 7)

    size, ninput, M = 32, 2, 16   # M = batched tree nodes (e.g. one chart level)

    # Config A: default TreeLSTM (inner_size=None -> no O/I), leaf=True for leaf_transform
    pa = init_tree_lstm(k_pa, size, inner_size=None, ninput=ninput, leaf=True)
    # Config B: bottlenecked TreeLSTM with I/O projections
    pb = init_tree_lstm(k_pb, size, inner_size=48, ninput=ninput, leaf=False)

    x = jax.random.normal(k_x, (M, size), jnp.float32)
    hs = [jax.random.normal(k_h0, (M, size), jnp.float32),
          jax.random.normal(k_h1, (M, size), jnp.float32)]
    cs = [jax.random.normal(k_c0, (M, size), jnp.float32),
          jax.random.normal(k_c1, (M, size), jnp.float32)]

    leaf_fn = jax.jit(lambda xx: tree_lstm_leaf_transform(pa, xx))
    fwd_a = jax.jit(lambda hh, cc: tree_lstm_forward(pa, hh, cc, constant=1.0))
    fwd_b = jax.jit(lambda hh, cc: tree_lstm_forward(pb, hh, cc, constant=1.0))

    h_leaf, c_leaf = jax.block_until_ready(leaf_fn(x))
    h_a, c_a = jax.block_until_ready(fwd_a(hs, cs))
    h_b, c_b = jax.block_until_ready(fwd_b(hs, cs))

    # validate against a pure-JAX reference of the same math
    hl_r, cl_r = leaf_transform_ref(pa, x)
    ha_r, ca_r = forward_ref(pa, hs, cs, 1.0)
    hb_r, cb_r = forward_ref(pb, hs, cs, 1.0)
    for got, want in [(h_leaf, hl_r), (c_leaf, cl_r),
                      (h_a, ha_r), (c_a, ca_r),
                      (h_b, hb_r), (c_b, cb_r)]:
        np.testing.assert_allclose(np.asarray(got), np.asarray(want),
                                   rtol=5e-4, atol=5e-4)

    print("KERNEL_OK")
</pallas_src>

<mosaic_0001>
module attributes {stable_mosaic.version = 11 : i64} {
  func.func @kernel(%arg0: i32, %arg1: memref<16x32xf32, #tpu.memory_space<vmem>>, %arg2: memref<32x384xf32, #tpu.memory_space<vmem>>, %arg3: memref<1x384xf32, #tpu.memory_space<vmem>>, %arg4: memref<16x256xf32, #tpu.memory_space<vmem>>) attributes {dimension_semantics = [#tpu.dimension_semantics<parallel>], iteration_bounds = array<i64: 1>, scalar_prefetch = 0 : i64, scratch_operands = 0 : i64, tpu.core_type = #tpu.core_type<tc>, window_params = [{transform_indices = @transform_0, window_bounds = array<i64: 16, 32>}, {pipeline_mode = #tpu.pipeline_mode<synchronous>, transform_indices = @transform_1, window_bounds = array<i64: 32, 384>}, {pipeline_mode = #tpu.pipeline_mode<synchronous>, transform_indices = @transform_2, window_bounds = array<i64: 1, 384>}, {transform_indices = @transform_3, window_bounds = array<i64: 16, 256>}]} {
    %c0 = arith.constant 0 : index
    %c0_0 = arith.constant 0 : index
    %0 = vector.load %arg1[%c0, %c0_0] : memref<16x32xf32, #tpu.memory_space<vmem>>, vector<16x32xf32>
    %c0_1 = arith.constant 0 : index
    %c0_2 = arith.constant 0 : index
    %1 = vector.load %arg2[%c0_1, %c0_2] : memref<32x384xf32, #tpu.memory_space<vmem>>, vector<32x384xf32>
    %cst = arith.constant dense<0.000000e+00> : vector<16x384xf32>
    %2 = tpu.matmul %0, %1, %cst {dimension_numbers = #tpu.dot_dimension_numbers<[1], [0], [0], [1], [0, 0, 1, 1], [], []>} : vector<16x32xf32>, vector<32x384xf32>, vector<16x384xf32> -> vector<16x384xf32>
    %c0_3 = arith.constant 0 : index
    %c0_4 = arith.constant 0 : index
    %3 = vector.load %arg3[%c0_3, %c0_4] : memref<1x384xf32, #tpu.memory_space<vmem>>, vector<1x384xf32>
    %4 = vector.broadcast %3 : vector<1x384xf32> to vector<16x384xf32>
    %5 = arith.addf %2, %4 : vector<16x384xf32>
    %6 = vector.extract_strided_slice %5 {offsets = [0, 0], sizes = [16, 128], strides = [1, 1]} : vector<16x384xf32> to vector<16x128xf32>
    %7 = math.tanh %6 : vector<16x128xf32>
    %8 = vector.extract_strided_slice %5 {offsets = [0, 128], sizes = [16, 128], strides = [1, 1]} : vector<16x384xf32> to vector<16x128xf32>
    %cst_5 = arith.constant 5.000000e-01 : f32
    %9 = vector.broadcast %cst_5 : f32 to vector<16x128xf32>
    %10 = arith.mulf %9, %8 : vector<16x128xf32>
    %11 = math.tanh %10 : vector<16x128xf32>
    %cst_6 = arith.constant 1.000000e+00 : f32
    %12 = vector.broadcast %cst_6 : f32 to vector<16x128xf32>
    %13 = arith.addf %11, %12 : vector<16x128xf32>
    %cst_7 = arith.constant 5.000000e-01 : f32
    %14 = vector.broadcast %cst_7 : f32 to vector<16x128xf32>
    %15 = arith.mulf %14, %13 : vector<16x128xf32>
    %16 = vector.extract_strided_slice %5 {offsets = [0, 256], sizes = [16, 128], strides = [1, 1]} : vector<16x384xf32> to vector<16x128xf32>
    %cst_8 = arith.constant 5.000000e-01 : f32
    %17 = vector.broadcast %cst_8 : f32 to vector<16x128xf32>
    %18 = arith.mulf %17, %16 : vector<16x128xf32>
    %19 = math.tanh %18 : vector<16x128xf32>
    %cst_9 = arith.constant 1.000000e+00 : f32
    %20 = vector.broadcast %cst_9 : f32 to vector<16x128xf32>
    %21 = arith.addf %19, %20 : vector<16x128xf32>
    %cst_10 = arith.constant 5.000000e-01 : f32
    %22 = vector.broadcast %cst_10 : f32 to vector<16x128xf32>
    %23 = arith.mulf %22, %21 : vector<16x128xf32>
    %24 = arith.mulf %15, %7 : vector<16x128xf32>
    %25 = math.tanh %24 : vector<16x128xf32>
    %26 = arith.mulf %23, %25 : vector<16x128xf32>
    %27 = tpu.concatenate %26, %24 in 1 : vector<16x128xf32>, vector<16x128xf32> -> vector<16x256xf32>
    %c0_11 = arith.constant 0 : index
    %c0_12 = arith.constant 0 : index
    %28 = vector.load %arg4[%c0_11, %c0_12] : memref<16x256xf32, #tpu.memory_space<vmem>>, vector<16x256xf32>
    tpu.vector_store %arg4[%c0_11, %c0_12], %27 {strides = array<i32>} : memref<16x256xf32, #tpu.memory_space<vmem>>, vector<16x256xf32>,
    return
  }
  func.func @transform_0(%arg0: i32) -> (i32, i32) {
    %c0_i32 = arith.constant 0 : i32
    %c0_i32_0 = arith.constant 0 : i32
    return %arg0, %c0_i32 : i32, i32
  }
  func.func @transform_1(%arg0: i32) -> (i32, i32) {
    %c0_i32 = arith.constant 0 : i32
    %c0_i32_0 = arith.constant 0 : i32
    %c0_i32_1 = arith.constant 0 : i32
    return %c0_i32, %c0_i32_0 : i32, i32
  }
  func.func @transform_2(%arg0: i32) -> (i32, i32) {
    %c0_i32 = arith.constant 0 : i32
    %c0_i32_0 = arith.constant 0 : i32
    %c0_i32_1 = arith.constant 0 : i32
    return %c0_i32, %c0_i32_0 : i32, i32
  }
  func.func @transform_3(%arg0: i32) -> (i32, i32) {
    %c0_i32 = arith.constant 0 : i32
    %c0_i32_0 = arith.constant 0 : i32
    return %arg0, %c0_i32 : i32, i32
  }
}

</mosaic_0001>

<bundles_post_ra>
// kernel: _lambda_.1
= control target key start
LH: loop header
LB: loop body
LE: loop exit
PB: predicated region body
PF: predicated region fallthrough
CT: control target
= control target key end

     0   :  { %8 = vsyncpa [#allocation3], 0  ;;  %s444_s0 = inlined_call_operand.hbm [shape: f32[16,32], index: 0, kind: input, shape index: {}]   ;;  %s445_s1 = inlined_call_operand.hbm [shape: f32[32,384], index: 1, kind: input, shape index: {}]   ;;  %s446_s2 = inlined_call_operand.vmem [shape: f32[1,384], index: 2, kind: input, shape index: {}]   ;;  %s447_s3 = inlined_call_operand.vmem [shape: f32[16,256], index: 3, kind: output, shape index: {}]  }
   0x1   :  { %9 = vsyncpa [#allocation5], 0  ;;  %s374_s12 = smov [#allocation2]   ;;  %s326_s16 = scalar_lea.hbm %s444_s0, 256 }
   0x2   :  { %s15_s13 = sshll.u32 %s374_s12, 4  ;;  %p327_p0 = scmp.ne.s32.totalorder %s444_s0, %s326_s16  ;;  %s16_s13 = int_to_ptr.vmem [resolvable:$true] %s15_s13 }
   0x3   :  { %p330_p1 = scmp.lt.u32.totalorder %s326_s16, %s444_s0 }
   0x5   :  { %p332_p2 = pnand %p330_p1, %p327_p0 }
   0x7   :  { %335 = shalt.err (!%p332_p2)
}
   0x8   :  { %s336_s21 = scalar_lea.vmem %s16_s13, 256  ;;  %p341_p4 = scmp.lt.s32.totalorder %s16_s13, %s16_s13 }
   0x9   :  { %p337_p3 = scmp.ne.s32.totalorder %s16_s13, %s336_s21  ;;  %p342_p5 = scmp.lt.s32.totalorder %s336_s21, %s336_s21 }
   0xb   :  { %p343_p6 = por %p342_p5, %p341_p4 }
   0xd   :  { %p344_p7 = pnand %p343_p6, %p337_p3 }
   0xf   :  { %347 = shalt.err (!%p344_p7)
}
  0x10   :  { %s375_s22 = smov 128   ;;  %s376_s23 = smov 8  }
  0x11   :  { %21 = dma.hbm_to_vmem [thread:$0]  %s444_s0, 256, %s16_s13, [#allocation3], %s375_s22, %s375_s22, %s376_s23  }
  0x12   :  { %s377_s26 = smov [#allocation4]   ;;  %s348_s30 = scalar_lea.hbm %s445_s1, 1536 }
  0x13   :  { %s27_s27 = sshll.u32 %s377_s26, 4  ;;  %p349_p8 = scmp.ne.s32.totalorder %s445_s1, %s348_s30  ;;  %s28_s27 = int_to_ptr.vmem [resolvable:$true] %s27_s27 }
  0x14   :  { %p352_p9 = scmp.lt.u32.totalorder %s348_s30, %s445_s1 }
  0x16   :  { %p354_p10 = pnand %p352_p9, %p349_p8 }
  0x18   :  { %357 = shalt.err (!%p354_p10)
}
  0x19   :  { %s358_s8 = scalar_lea.vmem %s28_s27, 1536  ;;  %p363_p12 = scmp.lt.s32.totalorder %s28_s27, %s28_s27 }
  0x1a   :  { %p359_p11 = scmp.ne.s32.totalorder %s28_s27, %s358_s8  ;;  %p364_p13 = scmp.lt.s32.totalorder %s358_s8, %s358_s8 }
  0x1c   :  { %p365_p0 = por %p364_p13, %p363_p12 }
  0x1e   :  { %p366_p1 = pnand %p365_p0, %p359_p11 }
  0x20   :  { %369 = shalt.err (!%p366_p1)
}
  0x21   :  { %s378_s0 = smov 384   ;;  %s379_s9 = smov 24  }
  0x22   :  { %33 = dma.hbm_to_vmem [thread:$0]  %s445_s1, 1536, %s28_s27, [#allocation5], %s378_s0, %s378_s0, %s379_s9  }
  0x23   :  { %370 = dma.done.wait [#allocation3], 256  }
  0x24   :  { %371 = vsyncadd [#allocation3], 4294967040 }
  0x25   :  { %372 = dma.done.wait [#allocation5], 1536  }
  0x26   :  { %373 = vsyncadd [#allocation5], 4294965760  ;;  %v380_v0 = vmov 0.0   ;;  %v45_v1 = vld [vmem:[#allocation4 + $0x8] sm:$0xff]  ;;  %v48_v2 = vld [vmem:[#allocation4 + $0x20] sm:$0xff]  ;;  %vm73_vm0 = vcmask 261120   ;;  %v58_v21 = vlaneseq }
  0x27   :  { %144 = vmatprep.mubr.f32.mxu0 %v380_v0  ;;  %v44_v3 = vld [vmem:[#allocation4] sm:$0xff]  ;;  %v287_v4 = vpack.c.bf16 %v48_v2, %v45_v1  ;;  %v47_v5 = vld [vmem:[#allocation4 + $0x18] sm:$0xff]  ;;  %v54_v7 = vld [vmem:[#allocation4 + $0x50] sm:$0xff] }
  0x28   :  { %v51_v6 = vld [vmem:[#allocation4 + $0x38] sm:$0xff]  ;;  %v289_v8 = vpack.c.bf16 %v47_v5, %v44_v3  ;;  %v50_v10 = vld [vmem:[#allocation4 + $0x30] sm:$0xff]  ;;  %v53_v11 = vld [vmem:[#allocation4 + $0x48] sm:$0xff]  ;;  %v59_v22 = vshrl.u32 %v58_v21, 7 }
  0x29   :  { %v291_v9 = vpack.c.bf16 %v54_v7, %v51_v6  ;;  %v42_v12 = vld [vmem:[#allocation2] sm:$0xff]  ;;  %288 = vmatprep.subr.bf16.mxu0 %v287_v4  ;;  %v49_v14 = vld [vmem:[#allocation4 + $0x28] sm:$0xff]  ;;  %v293_v15 = vpack.c.bf16 %v53_v11, %v50_v10  ;;  %v52_v17 = vld [vmem:[#allocation4 + $0x40] sm:$0xff] }
  0x2a   :  { %v46_v13 = vld [vmem:[#allocation4 + $0x10] sm:$0xff]  ;;  %284 = vmatprep.mubr.msk.f32.mxu1 %vm73_vm0, %v42_v12  ;;  %290 = vmatpush1.bf16.msra.mxu0 %v289_v8  ;;  %v55_v18 = vld [vmem:[#allocation4 + $0x58] sm:$0xff]  ;;  %v64_v23 = vsub.s32 1, %v59_v22  ;;  %v60_v25 = vsub.s32 0, %v59_v22  ;;  %v68_v26 = vsub.s32 2, %v59_v22 }
  0x2b   :  { %v295_v16 = vpack.c.bf16 %v49_v14, %v46_v13  ;;  %292 = vmatprep.subr.bf16.mxu0 %v291_v9  ;;  %v299_v19 = vpack.c.bf16 %v55_v18, %v52_v17  ;;  %v43_v20 = vld [vmem:[#allocation2 + $0x8] sm:$0xff]  ;;  %v56_v24 = vld [vmem:[%s446_s2] sm:$0x7] }
  0x2c   :  { %v65_v27 = vrot.slane %v56_v24, %v64_v23  ;;  %v61_v29 = vrot.slane %v56_v24, %v60_v25  ;;  %v69_v31 = vrot.slane %v56_v24, %v68_v26 }
  0x2d   :  { %296 = vmatprep.subr.bf16.mxu1 %v295_v16 }
  0x2e   :  { %298 = vmatpush3.bf16.msra.mxu1 %v295_v16  ;;  %294 = vmatpush1.bf16.msra.mxu0 %v293_v15 }
  0x2f   :  { %300 = vmatprep.subr.bf16.mxu1 %v299_v19 }
  0x31   :  { %266 = vmatmul.mubr.msk.f32.vlgmr.msra.gmra.mrb[0].mxu0 %vm73_vm0, %v42_v12 }
  0x32   :  { %302 = vmatpush3.bf16.msra.mxu1 %v299_v19  ;;  %150 = vmatprep.mubr.f32.mxu0 %v380_v0 }
  0x35   :  { %285 = vmatmul.mubr.msk.f32.vlgmr.msra.gmra.mrb[0].mxu1 %vm73_vm0, %v43_v20  ;;  %267 = vmatmul.mubr.msk.f32.gmra.mrb[2].mxu0 %vm73_vm0, %v43_v20 }
 0x104   :  { %v146_v28 = vpop.f32.mrb[0].mxu0 }
 0x105   :  { %v148_v30 = vpop.f32.mrb[1].mxu0  ;;  %v147_v37 = vadd.f32 %v146_v28, %v61_v29 }
 0x106   :  { %v149_v32 = vadd.f32 %v148_v30, %v65_v27 }
 0x108   :  { %v286_v33 = vpop.f32.mrb[0].mxu1  ;;  %v234_v34 = vmul.f32 0.5, %v149_v32  ;;  %v152_v35 = vpop.f32.mrb[2].mxu0 }
 0x109   :  { %v223_v36 = vpop.f32.mrb[1].mxu1  ;;  %v154_v38 = vpop.f32.mrb[3].mxu0  ;;  %v229_v42 = vadd.f32 %v286_v33, %v69_v31  ;;  %v153_v44 = vadd.f32 %v152_v35, %v61_v29 }
 0x10a   :  { %v224_v39 = vadd.f32 %v223_v36, %v69_v31  ;;  %310 = vtanh.f32 %v234_v34  ;;  %v155_v40 = vadd.f32 %v154_v38, %v65_v27 }
 0x10b   :  { %312 = vtanh.f32 %v147_v37  ;;  %v243_v45 = vmul.f32 0.5, %v229_v42 }
 0x10c   :  { %v235_v41 = vmul.f32 0.5, %v155_v40  ;;  %v242_v43 = vmul.f32 0.5, %v224_v39 }
 0x10e   :  { %314 = vtanh.f32 %v235_v41 }
 0x10f   :  { %316 = vtanh.f32 %v242_v43 }
 0x110   :  { %318 = vtanh.f32 %v153_v44 }
 0x111   :  { %320 = vtanh.f32 %v243_v45 }
 0x114   :  { %v311_v46 = vpop.eup %310 }
 0x115   :  { %v238_v47 = vadd.f32 1.0, %v311_v46  ;;  %v313_v48 = vpop.eup %312 }
 0x117   :  { %v240_v49 = vmul.f32 0.5, %v238_v47 }
 0x118   :  { %v315_v50 = vpop.eup %314 }
 0x119   :  { %v250_v51 = vmul.f32 %v313_v48, %v240_v49  ;;  %v239_v52 = vadd.f32 1.0, %v315_v50  ;;  %v317_v53 = vpop.eup %316 }
 0x11a   :  { %v319_v55 = vpop.eup %318  ;;  %v246_v57 = vadd.f32 1.0, %v317_v53 }
 0x11b   :  { %322 = vtanh.f32 %v250_v51  ;;  %257 = vst [vmem:[%s447_s3 + $0x8] sm:$0xff] %v250_v51  ;;  %v241_v54 = vmul.f32 0.5, %v239_v52  ;;  %v321_v58 = vpop.eup %320 }
 0x11c   :  { %v247_v59 = vadd.f32 1.0, %v321_v58  ;;  %v248_v60 = vmul.f32 0.5, %v246_v57 }
 0x11d   :  { %v251_v56 = vmul.f32 %v319_v55, %v241_v54 }
 0x11e   :  { %v249_v62 = vmul.f32 0.5, %v247_v59 }
 0x11f   :  { %324 = vtanh.f32 %v251_v56  ;;  %259 = vst [vmem:[%s447_s3 + $0x18] sm:$0xff] %v251_v56 }
 0x125   :  { %v323_v61 = vpop.eup %322 }
 0x126   :  { %v254_v63 = vmul.f32 %v323_v61, %v248_v60 }
 0x128   :  { %256 = vst [vmem:[%s447_s3] sm:$0xff] %v254_v63 }
 0x129   :  { %v325_v0 = vpop.eup %324 }
 0x12a   :  { %v255_v1 = vmul.f32 %v325_v0, %v249_v62 }
 0x12c   :  { %258 = vst [vmem:[%s447_s3 + $0x10] sm:$0xff] %v255_v1 }
 0x12d   :  { %264 = vsyncpa [#allocation3], 1 }
 0x12e   :  { %265 = vsyncpa [#allocation5], 1 }

</bundles_post_ra>
